<compile_context>
chip_gen: v7x
topology: tpu7x:2x2x1
jax: 0.10.0
libtpu: 0.0.40
codegen_flags: <defaults>
</compile_context>

<pallas_src>
import jax
import jax.numpy as jnp
from jax.experimental import pallas as pl
from jax.experimental.pallas import tpu as pltpu


_LANES = 512    # lane-dense slab width (multiple of 128 -> unmasked full-width stores)
_MAX_BLK_R = 512  # 512 x 512 f32 = 1 MiB per tile


def _round_up(a: int, b: int) -> int:
    return -(-a // b) * b


def _scale_kernel(scale_ref, x_ref, o_ref):
    """out = x * scale.  scale_ref: SMEM f32[1]; x/o: VMEM (BLK_R, LANES)."""
    s = scale_ref[0]
    # Widen in-registers only; HBM traffic stays in the native dtype.
    o_ref[...] = (x_ref[...].astype(jnp.float32) * s).astype(o_ref.dtype)


def scale_mul(x, scale):
    """Memory-bound elementwise `x * scale` as a Pallas kernel (any shape/dtype)."""
    orig_shape = x.shape
    total = int(x.size)
    rows = -(-total // _LANES)

    # Block-row choice: sublane-aligned, capped at _MAX_BLK_R; split into
    # >= 2 grid steps for megacore sharding once rows >= 16.
    if rows < 16:
        blk_r = _round_up(rows, 8)                          # tiny input: one block
    else:
        blk_r = min(_MAX_BLK_R, _round_up(-(-rows // 2), 8))  # >= 2 parallel steps
    rows_padded = _round_up(rows, blk_r)

    x_flat = x.reshape(-1)
    pad = rows_padded * _LANES - total
    if pad:
        x_flat = jnp.pad(x_flat, (0, pad))
    x2d = x_flat.reshape(rows_padded, _LANES)

    scale_smem = jnp.asarray(scale, dtype=jnp.float32).reshape(1)

    out2d = pl.pallas_call(
        _scale_kernel,
        out_shape=jax.ShapeDtypeStruct((rows_padded, _LANES), x.dtype),
        grid_spec=pltpu.PrefetchScalarGridSpec(
            num_scalar_prefetch=0,
            grid=(rows_padded // blk_r,),
            in_specs=[
                pl.BlockSpec(memory_space=pltpu.MemorySpace.SMEM),   # scale scalar
                pl.BlockSpec((blk_r, _LANES), lambda i: (i, 0)),     # x slab
            ],
            out_specs=pl.BlockSpec((blk_r, _LANES), lambda i: (i, 0)),
        ),
        compiler_params=pltpu.CompilerParams(
            dimension_semantics=("parallel",),
        ),
    )(scale_smem, x2d)

    return out2d.reshape(-1)[:total].reshape(orig_shape)


def unit_forward(x_freq, x_spat, params):
    """Reproduces Unit.forward semantics.

    Unit.forward:
        x_freq, x_freq = MFEM(x_freq, x_freq)   # tuple unpack keeps 2nd elem
        x_freq, x_freq = CAM(x_freq, x_freq)    # CAM undefined -> identity
        return (x_freq, x_freq)

    MFEM's second output is weight2(Trans(FFEM(x), SFEM(x))[1]); with the
    undefined submodules as identities the surviving value is x_freq * scale2.
    The weight1(out1) branch is dead and intentionally not computed.
    """
    # TODO(synk): Trans, FFEM, SFEM and CAM have no definitions in the provided
    # source; they are treated as identity passthroughs here.
    del x_spat  # Unit passes x_freq for both MFEM arguments; x_spat never matters.
    y = scale_mul(x_freq, params["scale2"])
    return (y, y)


def init_params():
    # MFEM.__init__: self.weight1 = Scale(1); self.weight2 = Scale(1)
    # scale1 is kept for parameter-fidelity but is dead in Unit.forward.
    return {
        "scale1": jnp.float32(1.0),
        "scale2": jnp.float32(1.0),
    }


if __name__ == "__main__":
    key = jax.random.PRNGKey(0)
    k1, k2 = jax.random.split(key)
    # batch=2, channel_in=4, spatial=16 (NCHW)
    x_freq = jax.random.normal(k1, (2, 4, 16, 16), dtype=jnp.float32)
    x_spat = jax.random.normal(k2, (2, 4, 16, 16), dtype=jnp.float32)  # unused (Unit aliases x_freq)

    params = init_params()
    fwd = jax.jit(unit_forward)
    out_a, out_b = fwd(x_freq, x_spat, params)
    jax.block_until_ready((out_a, out_b))

    # sanity: with identity submodules the output is x_freq * scale2
    assert out_a.shape == (2, 4, 16, 16) and out_b.shape == (2, 4, 16, 16)
    assert out_a.dtype == x_freq.dtype
    assert bool(jnp.allclose(out_a, x_freq * params["scale2"]))
    assert bool(jnp.allclose(out_a, out_b))
    print("KERNEL_OK")
</pallas_src>

<mosaic_0001>
module attributes {stable_mosaic.version = 11 : i64} {
  func.func @_scale_kernel(%arg0: i32, %arg1: memref<1xf32, #tpu.memory_space<smem>>, %arg2: memref<8x512xf32, #tpu.memory_space<vmem>>, %arg3: memref<8x512xf32, #tpu.memory_space<vmem>>) attributes {dimension_semantics = [#tpu.dimension_semantics<parallel>], iteration_bounds = array<i64: 1>, scalar_prefetch = 0 : i64, scratch_operands = 0 : i64, tpu.core_type = #tpu.core_type<tc>, window_params = [{transform_indices = @transform_0, window_bounds = array<i64: 1>}, {transform_indices = @transform_1, window_bounds = array<i64: 8, 512>}, {transform_indices = @transform_2, window_bounds = array<i64: 8, 512>}]} {
    %c0 = arith.constant 0 : index
    %0 = memref.load %arg1[%c0] : memref<1xf32, #tpu.memory_space<smem>>
    %c0_0 = arith.constant 0 : index
    %c0_1 = arith.constant 0 : index
    %1 = vector.load %arg2[%c0_0, %c0_1] : memref<8x512xf32, #tpu.memory_space<vmem>>, vector<8x512xf32>
    %2 = vector.broadcast %0 : f32 to vector<8x512xf32>
    %3 = arith.mulf %1, %2 : vector<8x512xf32>
    %c0_2 = arith.constant 0 : index
    %c0_3 = arith.constant 0 : index
    %4 = vector.load %arg3[%c0_2, %c0_3] : memref<8x512xf32, #tpu.memory_space<vmem>>, vector<8x512xf32>
    tpu.vector_store %arg3[%c0_2, %c0_3], %3 {strides = array<i32>} : memref<8x512xf32, #tpu.memory_space<vmem>>, vector<8x512xf32>,
    return
  }
  func.func @transform_0(%arg0: i32) -> i32 {
    %c0_i32 = arith.constant 0 : i32
    %c0_i32_0 = arith.constant 0 : i32
    return %c0_i32 : i32
  }
  func.func @transform_1(%arg0: i32) -> (i32, i32) {
    %c0_i32 = arith.constant 0 : i32
    %c0_i32_0 = arith.constant 0 : i32
    return %arg0, %c0_i32 : i32, i32
  }
  func.func @transform_2(%arg0: i32) -> (i32, i32) {
    %c0_i32 = arith.constant 0 : i32
    %c0_i32_0 = arith.constant 0 : i32
    return %arg0, %c0_i32 : i32, i32
  }
}

</mosaic_0001>

<bundles_post_ra>
// kernel: unit_forward.1
= control target key start
LH: loop header
LB: loop body
LE: loop exit
PB: predicated region body
PF: predicated region fallthrough
CT: control target
= control target key end

     0   :  { %s72_s0 = inlined_call_operand.<no memory space> [shape: f32[1], index: 0, kind: input, shape index: {}]   ;;  %s73_s1 = inlined_call_operand.vmem [shape: f32[8,512], index: 1, kind: input, shape index: {}]   ;;  %s74_s2 = inlined_call_operand.vmem [shape: f32[8,512], index: 2, kind: output, shape index: {}]  }
   0x1   :  { %v13_v0 = vld [vmem:[%s73_s1] sm:$0xff]  ;;  %v17_v1 = vstv %s72_s0  ;;  %v14_v2 = vld [vmem:[%s73_s1 + $0x8] sm:$0xff]  ;;  %v15_v3 = vld [vmem:[%s73_s1 + $0x10] sm:$0xff] }
   0x2   :  { %v18_v4 = vmul.f32 %v17_v1, %v13_v0  ;;  %v19_v5 = vmul.f32 %v17_v1, %v14_v2  ;;  %v20_v6 = vmul.f32 %v17_v1, %v15_v3  ;;  %v16_v7 = vld [vmem:[%s73_s1 + $0x18] sm:$0xff] }
   0x3   :  { %v21_v8 = vmul.f32 %v17_v1, %v16_v7 }
   0x4   :  { %22 = vst [vmem:[%s74_s2] sm:$0xff] %v18_v4  ;;  %23 = vst [vmem:[%s74_s2 + $0x8] sm:$0xff] %v19_v5 }
   0x5   :  { %24 = vst [vmem:[%s74_s2 + $0x10] sm:$0xff] %v20_v6  ;;  %25 = vst [vmem:[%s74_s2 + $0x18] sm:$0xff] %v21_v8 }

</bundles_post_ra>
